<compile_context>
chip_gen: v7x
topology: tpu7x:2x2x1
jax: 0.10.0
libtpu: 0.0.40
codegen_flags: <defaults>
</compile_context>

<pallas_src>
import functools

import jax
import jax.numpy as jnp
from jax import lax
from jax.experimental import pallas as pl
from jax.experimental.pallas import tpu as pltpu


def _round_up(x, m):
    return ((x + m - 1) // m) * m


def _birnn_kernel(x_ref, wih_ref, whh_ref, b_ref, out_ref, hn_ref, xproj_ref, *,
                  off_b):
    # x_ref:    (T, Bp, E)      time-major input, batch padded to Bp (mult. of 8)
    # wih_ref:  (E, Hpack)      W_ih_f^T at lanes [0:H), W_ih_b^T at [off_b:off_b+H)
    # whh_ref:  (Hpack, Hpack)  block-diagonal [W_hh_f^T ; W_hh_b^T] (128x128 when packed)
    # b_ref:    (1, Hpack)      combined biases (b_ih + b_hh) per direction
    # out_ref:  (T, Bp, Hpack)  packed hidden at step t: fwd(t) | bwd(T-1-t)
    # hn_ref:   (Bp, Hpack)     final packed hidden state
    # xproj_ref:(T, Bp, Hpack)  VMEM scratch: hoisted input projection (bias folded)
    T, Bp, E = x_ref.shape
    Hpack = whh_ref.shape[0]

    # ---- prologue: hoisted input projection, bias folded in (one MXU matmul) ----
    x2 = x_ref[...].reshape(T * Bp, E)
    proj = jnp.dot(x2, wih_ref[...], preferred_element_type=jnp.float32) + b_ref[...]
    xproj_ref[...] = proj.reshape(T, Bp, Hpack)

    # Hoisted loop invariants: lane-group mask and the packed W_hh (16 vregs).
    fwd_lane = lax.broadcasted_iota(jnp.int32, (Bp, Hpack), 1) < off_b
    whh = whh_ref[...]

    def step(t, h):
        # fwd group consumes x_t, bwd group consumes x_{T-1-t}; this select is
        # independent of h, so it stays off the serial dependent chain.
        xp = jnp.where(fwd_lane, xproj_ref[t], xproj_ref[T - 1 - t])
        # one fused MXU matmul (both directions) + one EUP tanh per time step
        h = jnp.tanh(xp + jnp.dot(h, whh, preferred_element_type=jnp.float32))
        out_ref[t] = h  # single full-lane, unmasked store per step
        return h

    h_fin = lax.fori_loop(0, T, step, jnp.zeros((Bp, Hpack), jnp.float32),
                          unroll=min(T, 8))
    hn_ref[...] = h_fin


def init_params(key, embed_dim, hidden_dim):
    """Deterministic init mirroring nn.RNN's U(-1/sqrt(H), 1/sqrt(H))."""
    bound = 1.0 / (hidden_dim ** 0.5)
    keys = jax.random.split(key, 8)

    def u(k, shape):
        return jax.random.uniform(k, shape, jnp.float32, -bound, bound)

    return dict(
        wih_f=u(keys[0], (hidden_dim, embed_dim)),
        whh_f=u(keys[1], (hidden_dim, hidden_dim)),
        bih_f=u(keys[2], (hidden_dim,)),
        bhh_f=u(keys[3], (hidden_dim,)),
        wih_b=u(keys[4], (hidden_dim, embed_dim)),
        whh_b=u(keys[5], (hidden_dim, hidden_dim)),
        bih_b=u(keys[6], (hidden_dim,)),
        bhh_b=u(keys[7], (hidden_dim,)),
    )


def simple_rnn_forward(x, params):
    """x: (B, T, E) batch_first float32 -> (output (B,T,2H), h_n (2,B,H))."""
    B, T, E = x.shape
    H = params["whh_f"].shape[0]
    Bp = _round_up(max(B, 8), 8)          # pad batch to full sublane tiles

    # Pack both directions into a single 128-lane group when they fit;
    # otherwise give each direction its own 128-lane-aligned group.
    off_b = H if 2 * H <= 128 else _round_up(H, 128)
    Hpack = _round_up(off_b + H, 128)

    # --- fused, packed weight layout ---
    wih = jnp.zeros((E, Hpack), jnp.float32)
    wih = wih.at[:, 0:H].set(params["wih_f"].T)
    wih = wih.at[:, off_b:off_b + H].set(params["wih_b"].T)

    whh = jnp.zeros((Hpack, Hpack), jnp.float32)          # block-diagonal W_hh
    whh = whh.at[0:H, 0:H].set(params["whh_f"].T)
    whh = whh.at[off_b:off_b + H, off_b:off_b + H].set(params["whh_b"].T)

    b = jnp.zeros((1, Hpack), jnp.float32)
    b = b.at[0, 0:H].set(params["bih_f"] + params["bhh_f"])
    b = b.at[0, off_b:off_b + H].set(params["bih_b"] + params["bhh_b"])

    # time-major input, batch padded (keeps the hoisted projection tile-aligned)
    x_tm = jnp.zeros((T, Bp, E), jnp.float32)
    x_tm = x_tm.at[:, :B, :].set(jnp.transpose(x, (1, 0, 2)))

    vmem = pl.BlockSpec(memory_space=pltpu.MemorySpace.VMEM)
    out_k, hn_k = pl.pallas_call(
        functools.partial(_birnn_kernel, off_b=off_b),
        out_shape=(jax.ShapeDtypeStruct((T, Bp, Hpack), jnp.float32),
                   jax.ShapeDtypeStruct((Bp, Hpack), jnp.float32)),
        in_specs=[vmem, vmem, vmem, vmem],
        out_specs=(vmem, vmem),
        scratch_shapes=[pltpu.VMEM((T, Bp, Hpack), jnp.float32)],
        compiler_params=pltpu.CompilerParams(vmem_limit_bytes=32 * 1024 * 1024),
    )(x_tm, wih, whh, b)

    # Wrapper: undo the backward-direction time order and stitch fwd||bwd.
    # These arrays are a few KiB; doing it here keeps masked stores / reversal
    # copies out of the serial per-step kernel body.
    out_fwd = out_k[:, :B, 0:H]                       # (T, B, H), time order
    out_bwd = out_k[::-1, :B, off_b:off_b + H]        # (T, B, H), un-reversed
    output = jnp.transpose(jnp.concatenate([out_fwd, out_bwd], axis=-1),
                           (1, 0, 2))                 # (B, T, 2H)
    h_n = jnp.stack([hn_k[:B, 0:H], hn_k[:B, off_b:off_b + H]], axis=0)  # (2,B,H)
    return output, h_n


def rnn_reference(x, params):
    """Pure-JAX reference matching torch.nn.RNN(bidirectional=True, batch_first=True)."""
    B, T, E = x.shape
    H = params["whh_f"].shape[0]

    def run_dir(wih, whh, bih, bhh, xs):
        def step(h, xt):
            h = jnp.tanh(xt @ wih.T + bih + h @ whh.T + bhh)
            return h, h
        h_last, ys = lax.scan(step, jnp.zeros((B, H), jnp.float32), xs)
        return h_last, ys

    x_tm = jnp.transpose(x, (1, 0, 2))
    hf, yf = run_dir(params["wih_f"], params["whh_f"],
                     params["bih_f"], params["bhh_f"], x_tm)
    hb, yb = run_dir(params["wih_b"], params["whh_b"],
                     params["bih_b"], params["bhh_b"], x_tm[::-1])
    yb = yb[::-1]
    out = jnp.transpose(jnp.concatenate([yf, yb], axis=-1), (1, 0, 2))
    hn = jnp.stack([hf, hb], axis=0)
    return out, hn


if __name__ == "__main__":
    B, T, E, H = 2, 8, 16, 32
    key = jax.random.PRNGKey(0)
    kx, kp = jax.random.split(key)
    x = jax.random.normal(kx, (B, T, E), jnp.float32)
    params = init_params(kp, E, H)

    fwd = jax.jit(simple_rnn_forward)
    out, h_n = fwd(x, params)
    jax.block_until_ready((out, h_n))

    ref_out, ref_hn = rnn_reference(x, params)
    assert out.shape == (B, T, 2 * H), out.shape
    assert h_n.shape == (2, B, H), h_n.shape
    assert jnp.allclose(out, ref_out, atol=1e-3, rtol=1e-3)
    assert jnp.allclose(h_n, ref_hn, atol=1e-3, rtol=1e-3)
    print("KERNEL_OK")
</pallas_src>

<mosaic_0001>
module attributes {stable_mosaic.version = 11 : i64} {
  func.func @_birnn_kernel(%arg0: memref<8x8x16xf32, #tpu.memory_space<vmem>>, %arg1: memref<16x128xf32, #tpu.memory_space<vmem>>, %arg2: memref<128x128xf32, #tpu.memory_space<vmem>>, %arg3: memref<1x128xf32, #tpu.memory_space<vmem>>, %arg4: memref<8x8x128xf32, #tpu.memory_space<vmem>>, %arg5: memref<8x128xf32, #tpu.memory_space<vmem>>, %arg6: memref<8x8x128xf32, #tpu.memory_space<vmem>>) attributes {dimension_semantics = [], scalar_prefetch = 0 : i64, scratch_operands = 1 : i64, tpu.core_type = #tpu.core_type<tc>} {
    %c0 = arith.constant 0 : index
    %c0_0 = arith.constant 0 : index
    %c0_1 = arith.constant 0 : index
    %0 = vector.load %arg0[%c0, %c0_0, %c0_1] : memref<8x8x16xf32, #tpu.memory_space<vmem>>, vector<8x8x16xf32>
    %1 = vector.shape_cast %0 : vector<8x8x16xf32> to vector<64x16xf32>
    %c0_2 = arith.constant 0 : index
    %c0_3 = arith.constant 0 : index
    %2 = vector.load %arg1[%c0_2, %c0_3] : memref<16x128xf32, #tpu.memory_space<vmem>>, vector<16x128xf32>
    %cst = arith.constant dense<0.000000e+00> : vector<64x128xf32>
    %3 = tpu.matmul %1, %2, %cst {dimension_numbers = #tpu.dot_dimension_numbers<[1], [0], [0], [1], [0, 0, 1, 1], [], []>} : vector<64x16xf32>, vector<16x128xf32>, vector<64x128xf32> -> vector<64x128xf32>
    %c0_4 = arith.constant 0 : index
    %c0_5 = arith.constant 0 : index
    %4 = vector.load %arg3[%c0_4, %c0_5] : memref<1x128xf32, #tpu.memory_space<vmem>>, vector<1x128xf32>
    %5 = vector.broadcast %4 : vector<1x128xf32> to vector<64x128xf32>
    %6 = arith.addf %3, %5 : vector<64x128xf32>
    %7 = vector.shape_cast %6 : vector<64x128xf32> to vector<8x8x128xf32>
    %c0_6 = arith.constant 0 : index
    %c0_7 = arith.constant 0 : index
    %c0_8 = arith.constant 0 : index
    %8 = vector.load %arg6[%c0_6, %c0_7, %c0_8] : memref<8x8x128xf32, #tpu.memory_space<vmem>>, vector<8x8x128xf32>
    tpu.vector_store %arg6[%c0_6, %c0_7, %c0_8], %7 {strides = array<i32>} : memref<8x8x128xf32, #tpu.memory_space<vmem>>, vector<8x8x128xf32>,
    %9 = tpu.iota {dimensions = array<i32: 1>} : vector<8x128xi32>
    %c32_i32 = arith.constant 32 : i32
    %10 = vector.broadcast %c32_i32 : i32 to vector<8x128xi32>
    %11 = arith.cmpi slt, %9, %10 : vector<8x128xi32>
    %c0_9 = arith.constant 0 : index
    %c0_10 = arith.constant 0 : index
    %12 = vector.load %arg2[%c0_9, %c0_10] : memref<128x128xf32, #tpu.memory_space<vmem>>, vector<128x128xf32>
    %cst_11 = arith.constant 0.000000e+00 : f32
    %13 = vector.broadcast %cst_11 : f32 to vector<8x128xf32>
    %c0_i32 = arith.constant 0 : i32
    %14 = arith.index_cast %c0_i32 : i32 to index
    %c0_12 = arith.constant 0 : index
    %c0_13 = arith.constant 0 : index
    %15 = vector.load %arg6[%14, %c0_12, %c0_13] : memref<8x8x128xf32, #tpu.memory_space<vmem>>, vector<1x8x128xf32>
    %16 = vector.shape_cast %15 : vector<1x8x128xf32> to vector<8x128xf32>
    %c7_i32 = arith.constant 7 : i32
    %17 = arith.subi %c7_i32, %c0_i32 : i32
    %18 = arith.index_cast %17 : i32 to index
    %c0_14 = arith.constant 0 : index
    %c0_15 = arith.constant 0 : index
    %19 = vector.load %arg6[%18, %c0_14, %c0_15] : memref<8x8x128xf32, #tpu.memory_space<vmem>>, vector<1x8x128xf32>
    %20 = vector.shape_cast %19 : vector<1x8x128xf32> to vector<8x128xf32>
    %21 = arith.select %11, %16, %20 : vector<8x128xi1>, vector<8x128xf32>
    %cst_16 = arith.constant dense<0.000000e+00> : vector<8x128xf32>
    %22 = tpu.matmul %13, %12, %cst_16 {dimension_numbers = #tpu.dot_dimension_numbers<[1], [0], [0], [1], [0, 0, 1, 1], [], []>} : vector<8x128xf32>, vector<128x128xf32>, vector<8x128xf32> -> vector<8x128xf32>
    %23 = arith.addf %21, %22 : vector<8x128xf32>
    %24 = math.tanh %23 : vector<8x128xf32>
    %25 = arith.index_cast %c0_i32 : i32 to index
    %c0_17 = arith.constant 0 : index
    %c0_18 = arith.constant 0 : index
    %26 = vector.load %arg4[%25, %c0_17, %c0_18] : memref<8x8x128xf32, #tpu.memory_space<vmem>>, vector<1x8x128xf32>
    %27 = vector.shape_cast %26 : vector<1x8x128xf32> to vector<8x128xf32>
    %28 = vector.shape_cast %24 : vector<8x128xf32> to vector<1x8x128xf32>
    tpu.vector_store %arg4[%25, %c0_17, %c0_18], %28 {strides = array<i32>} : memref<8x8x128xf32, #tpu.memory_space<vmem>>, vector<1x8x128xf32>,
    %c1_i32 = arith.constant 1 : i32
    %29 = arith.index_cast %c1_i32 : i32 to index
    %c0_19 = arith.constant 0 : index
    %c0_20 = arith.constant 0 : index
    %30 = vector.load %arg6[%29, %c0_19, %c0_20] : memref<8x8x128xf32, #tpu.memory_space<vmem>>, vector<1x8x128xf32>
    %31 = vector.shape_cast %30 : vector<1x8x128xf32> to vector<8x128xf32>
    %c7_i32_21 = arith.constant 7 : i32
    %32 = arith.subi %c7_i32_21, %c1_i32 : i32
    %33 = arith.index_cast %32 : i32 to index
    %c0_22 = arith.constant 0 : index
    %c0_23 = arith.constant 0 : index
    %34 = vector.load %arg6[%33, %c0_22, %c0_23] : memref<8x8x128xf32, #tpu.memory_space<vmem>>, vector<1x8x128xf32>
    %35 = vector.shape_cast %34 : vector<1x8x128xf32> to vector<8x128xf32>
    %36 = arith.select %11, %31, %35 : vector<8x128xi1>, vector<8x128xf32>
    %cst_24 = arith.constant dense<0.000000e+00> : vector<8x128xf32>
    %37 = tpu.matmul %24, %12, %cst_24 {dimension_numbers = #tpu.dot_dimension_numbers<[1], [0], [0], [1], [0, 0, 1, 1], [], []>} : vector<8x128xf32>, vector<128x128xf32>, vector<8x128xf32> -> vector<8x128xf32>
    %38 = arith.addf %36, %37 : vector<8x128xf32>
    %39 = math.tanh %38 : vector<8x128xf32>
    %40 = arith.index_cast %c1_i32 : i32 to index
    %c0_25 = arith.constant 0 : index
    %c0_26 = arith.constant 0 : index
    %41 = vector.load %arg4[%40, %c0_25, %c0_26] : memref<8x8x128xf32, #tpu.memory_space<vmem>>, vector<1x8x128xf32>
    %42 = vector.shape_cast %41 : vector<1x8x128xf32> to vector<8x128xf32>
    %43 = vector.shape_cast %39 : vector<8x128xf32> to vector<1x8x128xf32>
    tpu.vector_store %arg4[%40, %c0_25, %c0_26], %43 {strides = array<i32>} : memref<8x8x128xf32, #tpu.memory_space<vmem>>, vector<1x8x128xf32>,
    %c2_i32 = arith.constant 2 : i32
    %44 = arith.index_cast %c2_i32 : i32 to index
    %c0_27 = arith.constant 0 : index
    %c0_28 = arith.constant 0 : index
    %45 = vector.load %arg6[%44, %c0_27, %c0_28] : memref<8x8x128xf32, #tpu.memory_space<vmem>>, vector<1x8x128xf32>
    %46 = vector.shape_cast %45 : vector<1x8x128xf32> to vector<8x128xf32>
    %c7_i32_29 = arith.constant 7 : i32
    %47 = arith.subi %c7_i32_29, %c2_i32 : i32
    %48 = arith.index_cast %47 : i32 to index
    %c0_30 = arith.constant 0 : index
    %c0_31 = arith.constant 0 : index
    %49 = vector.load %arg6[%48, %c0_30, %c0_31] : memref<8x8x128xf32, #tpu.memory_space<vmem>>, vector<1x8x128xf32>
    %50 = vector.shape_cast %49 : vector<1x8x128xf32> to vector<8x128xf32>
    %51 = arith.select %11, %46, %50 : vector<8x128xi1>, vector<8x128xf32>
    %cst_32 = arith.constant dense<0.000000e+00> : vector<8x128xf32>
    %52 = tpu.matmul %39, %12, %cst_32 {dimension_numbers = #tpu.dot_dimension_numbers<[1], [0], [0], [1], [0, 0, 1, 1], [], []>} : vector<8x128xf32>, vector<128x128xf32>, vector<8x128xf32> -> vector<8x128xf32>
    %53 = arith.addf %51, %52 : vector<8x128xf32>
    %54 = math.tanh %53 : vector<8x128xf32>
    %55 = arith.index_cast %c2_i32 : i32 to index
    %c0_33 = arith.constant 0 : index
    %c0_34 = arith.constant 0 : index
    %56 = vector.load %arg4[%55, %c0_33, %c0_34] : memref<8x8x128xf32, #tpu.memory_space<vmem>>, vector<1x8x128xf32>
    %57 = vector.shape_cast %56 : vector<1x8x128xf32> to vector<8x128xf32>
    %58 = vector.shape_cast %54 : vector<8x128xf32> to vector<1x8x128xf32>
    tpu.vector_store %arg4[%55, %c0_33, %c0_34], %58 {strides = array<i32>} : memref<8x8x128xf32, #tpu.memory_space<vmem>>, vector<1x8x128xf32>,
    %c3_i32 = arith.constant 3 : i32
    %59 = arith.index_cast %c3_i32 : i32 to index
    %c0_35 = arith.constant 0 : index
    %c0_36 = arith.constant 0 : index
    %60 = vector.load %arg6[%59, %c0_35, %c0_36] : memref<8x8x128xf32, #tpu.memory_space<vmem>>, vector<1x8x128xf32>
    %61 = vector.shape_cast %60 : vector<1x8x128xf32> to vector<8x128xf32>
    %c7_i32_37 = arith.constant 7 : i32
    %62 = arith.subi %c7_i32_37, %c3_i32 : i32
    %63 = arith.index_cast %62 : i32 to index
    %c0_38 = arith.constant 0 : index
    %c0_39 = arith.constant 0 : index
    %64 = vector.load %arg6[%63, %c0_38, %c0_39] : memref<8x8x128xf32, #tpu.memory_space<vmem>>, vector<1x8x128xf32>
    %65 = vector.shape_cast %64 : vector<1x8x128xf32> to vector<8x128xf32>
    %66 = arith.select %11, %61, %65 : vector<8x128xi1>, vector<8x128xf32>
    %cst_40 = arith.constant dense<0.000000e+00> : vector<8x128xf32>
    %67 = tpu.matmul %54, %12, %cst_40 {dimension_numbers = #tpu.dot_dimension_numbers<[1], [0], [0], [1], [0, 0, 1, 1], [], []>} : vector<8x128xf32>, vector<128x128xf32>, vector<8x128xf32> -> vector<8x128xf32>
    %68 = arith.addf %66, %67 : vector<8x128xf32>
    %69 = math.tanh %68 : vector<8x128xf32>
    %70 = arith.index_cast %c3_i32 : i32 to index
    %c0_41 = arith.constant 0 : index
    %c0_42 = arith.constant 0 : index
    %71 = vector.load %arg4[%70, %c0_41, %c0_42] : memref<8x8x128xf32, #tpu.memory_space<vmem>>, vector<1x8x128xf32>
    %72 = vector.shape_cast %71 : vector<1x8x128xf32> to vector<8x128xf32>
    %73 = vector.shape_cast %69 : vector<8x128xf32> to vector<1x8x128xf32>
    tpu.vector_store %arg4[%70, %c0_41, %c0_42], %73 {strides = array<i32>} : memref<8x8x128xf32, #tpu.memory_space<vmem>>, vector<1x8x128xf32>,
    %c4_i32 = arith.constant 4 : i32
    %74 = arith.index_cast %c4_i32 : i32 to index
    %c0_43 = arith.constant 0 : index
    %c0_44 = arith.constant 0 : index
    %75 = vector.load %arg6[%74, %c0_43, %c0_44] : memref<8x8x128xf32, #tpu.memory_space<vmem>>, vector<1x8x128xf32>
    %76 = vector.shape_cast %75 : vector<1x8x128xf32> to vector<8x128xf32>
    %c7_i32_45 = arith.constant 7 : i32
    %77 = arith.subi %c7_i32_45, %c4_i32 : i32
    %78 = arith.index_cast %77 : i32 to index
    %c0_46 = arith.constant 0 : index
    %c0_47 = arith.constant 0 : index
    %79 = vector.load %arg6[%78, %c0_46, %c0_47] : memref<8x8x128xf32, #tpu.memory_space<vmem>>, vector<1x8x128xf32>
    %80 = vector.shape_cast %79 : vector<1x8x128xf32> to vector<8x128xf32>
    %81 = arith.select %11, %76, %80 : vector<8x128xi1>, vector<8x128xf32>
    %cst_48 = arith.constant dense<0.000000e+00> : vector<8x128xf32>
    %82 = tpu.matmul %69, %12, %cst_48 {dimension_numbers = #tpu.dot_dimension_numbers<[1], [0], [0], [1], [0, 0, 1, 1], [], []>} : vector<8x128xf32>, vector<128x128xf32>, vector<8x128xf32> -> vector<8x128xf32>
    %83 = arith.addf %81, %82 : vector<8x128xf32>
    %84 = math.tanh %83 : vector<8x128xf32>
    %85 = arith.index_cast %c4_i32 : i32 to index
    %c0_49 = arith.constant 0 : index
    %c0_50 = arith.constant 0 : index
    %86 = vector.load %arg4[%85, %c0_49, %c0_50] : memref<8x8x128xf32, #tpu.memory_space<vmem>>, vector<1x8x128xf32>
    %87 = vector.shape_cast %86 : vector<1x8x128xf32> to vector<8x128xf32>
    %88 = vector.shape_cast %84 : vector<8x128xf32> to vector<1x8x128xf32>
    tpu.vector_store %arg4[%85, %c0_49, %c0_50], %88 {strides = array<i32>} : memref<8x8x128xf32, #tpu.memory_space<vmem>>, vector<1x8x128xf32>,
    %c5_i32 = arith.constant 5 : i32
    %89 = arith.index_cast %c5_i32 : i32 to index
    %c0_51 = arith.constant 0 : index
    %c0_52 = arith.constant 0 : index
    %90 = vector.load %arg6[%89, %c0_51, %c0_52] : memref<8x8x128xf32, #tpu.memory_space<vmem>>, vector<1x8x128xf32>
    %91 = vector.shape_cast %90 : vector<1x8x128xf32> to vector<8x128xf32>
    %c7_i32_53 = arith.constant 7 : i32
    %92 = arith.subi %c7_i32_53, %c5_i32 : i32
    %93 = arith.index_cast %92 : i32 to index
    %c0_54 = arith.constant 0 : index
    %c0_55 = arith.constant 0 : index
    %94 = vector.load %arg6[%93, %c0_54, %c0_55] : memref<8x8x128xf32, #tpu.memory_space<vmem>>, vector<1x8x128xf32>
    %95 = vector.shape_cast %94 : vector<1x8x128xf32> to vector<8x128xf32>
    %96 = arith.select %11, %91, %95 : vector<8x128xi1>, vector<8x128xf32>
    %cst_56 = arith.constant dense<0.000000e+00> : vector<8x128xf32>
    %97 = tpu.matmul %84, %12, %cst_56 {dimension_numbers = #tpu.dot_dimension_numbers<[1], [0], [0], [1], [0, 0, 1, 1], [], []>} : vector<8x128xf32>, vector<128x128xf32>, vector<8x128xf32> -> vector<8x128xf32>
    %98 = arith.addf %96, %97 : vector<8x128xf32>
    %99 = math.tanh %98 : vector<8x128xf32>
    %100 = arith.index_cast %c5_i32 : i32 to index
    %c0_57 = arith.constant 0 : index
    %c0_58 = arith.constant 0 : index
    %101 = vector.load %arg4[%100, %c0_57, %c0_58] : memref<8x8x128xf32, #tpu.memory_space<vmem>>, vector<1x8x128xf32>
    %102 = vector.shape_cast %101 : vector<1x8x128xf32> to vector<8x128xf32>
    %103 = vector.shape_cast %99 : vector<8x128xf32> to vector<1x8x128xf32>
    tpu.vector_store %arg4[%100, %c0_57, %c0_58], %103 {strides = array<i32>} : memref<8x8x128xf32, #tpu.memory_space<vmem>>, vector<1x8x128xf32>,
    %c6_i32 = arith.constant 6 : i32
    %104 = arith.index_cast %c6_i32 : i32 to index
    %c0_59 = arith.constant 0 : index
    %c0_60 = arith.constant 0 : index
    %105 = vector.load %arg6[%104, %c0_59, %c0_60] : memref<8x8x128xf32, #tpu.memory_space<vmem>>, vector<1x8x128xf32>
    %106 = vector.shape_cast %105 : vector<1x8x128xf32> to vector<8x128xf32>
    %c7_i32_61 = arith.constant 7 : i32
    %107 = arith.subi %c7_i32_61, %c6_i32 : i32
    %108 = arith.index_cast %107 : i32 to index
    %c0_62 = arith.constant 0 : index
    %c0_63 = arith.constant 0 : index
    %109 = vector.load %arg6[%108, %c0_62, %c0_63] : memref<8x8x128xf32, #tpu.memory_space<vmem>>, vector<1x8x128xf32>
    %110 = vector.shape_cast %109 : vector<1x8x128xf32> to vector<8x128xf32>
    %111 = arith.select %11, %106, %110 : vector<8x128xi1>, vector<8x128xf32>
    %cst_64 = arith.constant dense<0.000000e+00> : vector<8x128xf32>
    %112 = tpu.matmul %99, %12, %cst_64 {dimension_numbers = #tpu.dot_dimension_numbers<[1], [0], [0], [1], [0, 0, 1, 1], [], []>} : vector<8x128xf32>, vector<128x128xf32>, vector<8x128xf32> -> vector<8x128xf32>
    %113 = arith.addf %111, %112 : vector<8x128xf32>
    %114 = math.tanh %113 : vector<8x128xf32>
    %115 = arith.index_cast %c6_i32 : i32 to index
    %c0_65 = arith.constant 0 : index
    %c0_66 = arith.constant 0 : index
    %116 = vector.load %arg4[%115, %c0_65, %c0_66] : memref<8x8x128xf32, #tpu.memory_space<vmem>>, vector<1x8x128xf32>
    %117 = vector.shape_cast %116 : vector<1x8x128xf32> to vector<8x128xf32>
    %118 = vector.shape_cast %114 : vector<8x128xf32> to vector<1x8x128xf32>
    tpu.vector_store %arg4[%115, %c0_65, %c0_66], %118 {strides = array<i32>} : memref<8x8x128xf32, #tpu.memory_space<vmem>>, vector<1x8x128xf32>,
    %c7_i32_67 = arith.constant 7 : i32
    %119 = arith.index_cast %c7_i32_67 : i32 to index
    %c0_68 = arith.constant 0 : index
    %c0_69 = arith.constant 0 : index
    %120 = vector.load %arg6[%119, %c0_68, %c0_69] : memref<8x8x128xf32, #tpu.memory_space<vmem>>, vector<1x8x128xf32>
    %121 = vector.shape_cast %120 : vector<1x8x128xf32> to vector<8x128xf32>
    %c7_i32_70 = arith.constant 7 : i32
    %122 = arith.subi %c7_i32_70, %c7_i32_67 : i32
    %123 = arith.index_cast %122 : i32 to index
    %c0_71 = arith.constant 0 : index
    %c0_72 = arith.constant 0 : index
    %124 = vector.load %arg6[%123, %c0_71, %c0_72] : memref<8x8x128xf32, #tpu.memory_space<vmem>>, vector<1x8x128xf32>
    %125 = vector.shape_cast %124 : vector<1x8x128xf32> to vector<8x128xf32>
    %126 = arith.select %11, %121, %125 : vector<8x128xi1>, vector<8x128xf32>
    %cst_73 = arith.constant dense<0.000000e+00> : vector<8x128xf32>
    %127 = tpu.matmul %114, %12, %cst_73 {dimension_numbers = #tpu.dot_dimension_numbers<[1], [0], [0], [1], [0, 0, 1, 1], [], []>} : vector<8x128xf32>, vector<128x128xf32>, vector<8x128xf32> -> vector<8x128xf32>
    %128 = arith.addf %126, %127 : vector<8x128xf32>
    %129 = math.tanh %128 : vector<8x128xf32>
    %130 = arith.index_cast %c7_i32_67 : i32 to index
    %c0_74 = arith.constant 0 : index
    %c0_75 = arith.constant 0 : index
    %131 = vector.load %arg4[%130, %c0_74, %c0_75] : memref<8x8x128xf32, #tpu.memory_space<vmem>>, vector<1x8x128xf32>
    %132 = vector.shape_cast %131 : vector<1x8x128xf32> to vector<8x128xf32>
    %133 = vector.shape_cast %129 : vector<8x128xf32> to vector<1x8x128xf32>
    tpu.vector_store %arg4[%130, %c0_74, %c0_75], %133 {strides = array<i32>} : memref<8x8x128xf32, #tpu.memory_space<vmem>>, vector<1x8x128xf32>,
    %c8_i32 = arith.constant 8 : i32
    %c0_76 = arith.constant 0 : index
    %c0_77 = arith.constant 0 : index
    %134 = vector.load %arg5[%c0_76, %c0_77] : memref<8x128xf32, #tpu.memory_space<vmem>>, vector<8x128xf32>
    tpu.vector_store %arg5[%c0_76, %c0_77], %129 {strides = array<i32>} : memref<8x128xf32, #tpu.memory_space<vmem>>, vector<8x128xf32>,
    return
  }
}

</mosaic_0001>

<bundles_post_ra>
// kernel: simple_rnn_forward.1
= control target key start
LH: loop header
LB: loop body
LE: loop exit
PB: predicated region body
PF: predicated region fallthrough
CT: control target
= control target key end

     0   :  { %vm36_vm0 = vcmask 130048   ;;  %v1497_v0 = vmov 0.0|0.0   ;;  %vm1498_vm1 = vmmov 0   ;;  %v1499_v4 = vmov 0.0   ;;  %s1822_s1 = inlined_call_operand.vmem [shape: f32[16,128], index: 1, kind: input, shape index: {}]   ;;  %s1823_s2 = inlined_call_operand.vmem [shape: f32[128,128], index: 2, kind: input, shape index: {}]   ;;  %s1824_s0 = inlined_call_operand.vmem [shape: f32[8,8,16], index: 0, kind: input, shape index: {}]   ;;  %s1825_s3 = inlined_call_operand.vmem [shape: f32[1,128], index: 3, kind: input, shape index: {}]   ;;  %s1826_s4 = inlined_call_operand.vmem [shape: f32[8,8,128], index: 4, kind: output, shape index: {0}]   ;;  %s1827_s5 = inlined_call_operand.vmem [shape: f32[8,128], index: 5, kind: output, shape index: {1}]  }
   0x1   :  { %1286 = vmatprep.subr.bf16.mxu1 %v1497_v0  ;;  %v27_v1 = vld [vmem:[%s1822_s1] sm:$0xff]  ;;  %v28_v2 = vld [vmem:[%s1822_s1 + $0x8] sm:$0xff]  ;;  %1034 = vmatprep.mubr.msk.f32.mxu1 %vm1498_vm1, %v1499_v4  ;;  %v179_v9 = vld [vmem:[%s1823_s2 + $0x10] sm:$0xff]  ;;  %v174_v41 = vlaneseq }
   0x2   :  { %v177_v3 = vld [vmem:[%s1823_s2] sm:$0xff]  ;;  %v1282_v5 = vpack.c.bf16 %v28_v2, %v27_v1  ;;  %v178_v6 = vld [vmem:[%s1823_s2 + $0x8] sm:$0xff]  ;;  %v180_v10 = vld [vmem:[%s1823_s2 + $0x18] sm:$0xff] }
   0x3   :  { %v19_v7 = vld [vmem:[%s1824_s0] sm:$0xff]  ;;  %v1548_v8 = vpack.c.bf16 %v178_v6, %v177_v3  ;;  %v20_v11 = vld [vmem:[%s1824_s0 + $0x8] sm:$0xff]  ;;  %v1561_v12 = vpack.c.bf16 %v180_v10, %v179_v9  ;;  %v21_v13 = vld [vmem:[%s1824_s0 + $0x10] sm:$0xff]  ;;  %v175_v46 = vand.u32 127, %v174_v41 }
   0x4   :  { %990 = vmatprep.mubr.msk.f32.mxu0 %vm36_vm0, %v19_v7  ;;  %1283 = vmatprep.subr.bf16.mxu0 %v1282_v5  ;;  %v181_v14 = vld [vmem:[%s1823_s2 + $0x20] sm:$0xff]  ;;  %v182_v15 = vld [vmem:[%s1823_s2 + $0x28] sm:$0xff]  ;;  %v22_v16 = vld [vmem:[%s1824_s0 + $0x18] sm:$0xff] }
   0x5   :  { %1288 = vmatpush3.bf16.msra.mxu1 %v1548_v8  ;;  %1285 = vmatpush3.bf16.msra.mxu0 %v1282_v5  ;;  %v1580_v17 = vpack.c.bf16 %v182_v15, %v181_v14  ;;  %v23_v18 = vld [vmem:[%s1824_s0 + $0x20] sm:$0xff]  ;;  %v183_v19 = vld [vmem:[%s1823_s2 + $0x30] sm:$0xff]  ;;  %v184_v20 = vld [vmem:[%s1823_s2 + $0x38] sm:$0xff]  ;;  %vm176_vm2 = vcmp.lt.s32.totalorder %v175_v46, 32 }
   0x6   :  { %1289 = vmatprep.subr.bf16.mxu1 %v1497_v0  ;;  %1310 = vmatprep.subr.bf16.mxu0 %v1497_v0  ;;  %v24_v21 = vld [vmem:[%s1824_s0 + $0x28] sm:$0xff]  ;;  %v1600_v22 = vpack.c.bf16 %v184_v20, %v183_v19  ;;  %v25_v23 = vld [vmem:[%s1824_s0 + $0x30] sm:$0xff]  ;;  %v185_v24 = vld [vmem:[%s1823_s2 + $0x40] sm:$0xff] }
   0x7   :  { %v186_v25 = vld [vmem:[%s1823_s2 + $0x48] sm:$0xff]  ;;  %v26_v26 = vld [vmem:[%s1824_s0 + $0x38] sm:$0xff]  ;;  %v187_v28 = vld [vmem:[%s1823_s2 + $0x50] sm:$0xff] }
   0x8   :  { %991 = vmatmul.mubr.msk.f32.vlgmr.msra.gmra.mrb[0].mxu0 %vm36_vm0, %v20_v11  ;;  %v1620_v27 = vpack.c.bf16 %v186_v25, %v185_v24  ;;  %v188_v29 = vld [vmem:[%s1823_s2 + $0x58] sm:$0xff]  ;;  %v189_v31 = vld [vmem:[%s1823_s2 + $0x60] sm:$0xff]  ;;  %v190_v32 = vld [vmem:[%s1823_s2 + $0x68] sm:$0xff] }
   0x9   :  { %1291 = vmatpush3.bf16.msra.mxu1 %v1561_v12  ;;  %993 = vmatprep.mubr.msk.f32.mxu0 %vm36_vm0, %v21_v13  ;;  %v1633_v30 = vpack.c.bf16 %v188_v29, %v187_v28  ;;  %v1647_v33 = vpack.c.bf16 %v190_v32, %v189_v31  ;;  %v191_v34 = vld [vmem:[%s1823_s2 + $0x70] sm:$0xff]  ;;  %v192_v35 = vld [vmem:[%s1823_s2 + $0x78] sm:$0xff]  ;;  %v824_v37 = vld [vmem:[%s1825_s3] ss:$0 sm:$0xff] }
   0xa   :  { %1292 = vmatprep.subr.bf16.mxu1 %v1497_v0  ;;  %1312 = vmatpush3.bf16.msra.mxu0 %v1548_v8  ;;  %v1659_v36 = vpack.c.bf16 %v192_v35, %v191_v34 }
   0xb   :  { %1313 = vmatprep.subr.bf16.mxu0 %v1497_v0 }
   0xc   :  { %994 = vmatmul.mubr.msk.f32.gmra.mrb[2].mxu0 %vm36_vm0, %v22_v16 }
   0xd   :  { %1294 = vmatpush3.bf16.msra.mxu1 %v1580_v17  ;;  %996 = vmatprep.mubr.msk.f32.mxu0 %vm36_vm0, %v23_v18 }
   0xe   :  { %1295 = vmatprep.subr.bf16.mxu1 %v1497_v0  ;;  %1315 = vmatpush3.bf16.msra.mxu0 %v1561_v12 }
   0xf   :  { %1316 = vmatprep.subr.bf16.mxu0 %v1497_v0 }
  0x10   :  { %997 = vmatmul.mubr.msk.f32.gmra.mrb[4].mxu0 %vm36_vm0, %v24_v21 }
  0x11   :  { %1297 = vmatpush3.bf16.msra.mxu1 %v1600_v22  ;;  %999 = vmatprep.mubr.msk.f32.mxu0 %vm36_vm0, %v25_v23 }
  0x12   :  { %1298 = vmatprep.subr.bf16.mxu1 %v1497_v0  ;;  %1318 = vmatpush3.bf16.msra.mxu0 %v1580_v17 }
  0x13   :  { %1319 = vmatprep.subr.bf16.mxu0 %v1497_v0 }
  0x14   :  { %1000 = vmatmul.mubr.msk.f32.gmra.mrb[6].mxu0 %vm36_vm0, %v26_v26 }
  0x15   :  { %1300 = vmatpush3.bf16.msra.mxu1 %v1620_v27  ;;  %1069 = vmatprep.mubr.msk.f32.mxu0 %vm1498_vm1, %v1499_v4 }
  0x16   :  { %1301 = vmatprep.subr.bf16.mxu1 %v1497_v0  ;;  %1321 = vmatpush3.bf16.msra.mxu0 %v1600_v22 }
  0x17   :  { %1322 = vmatprep.subr.bf16.mxu0 %v1497_v0 }
  0x19   :  { %1303 = vmatpush3.bf16.msra.mxu1 %v1633_v30 }
  0x1a   :  { %1304 = vmatprep.subr.bf16.mxu1 %v1497_v0  ;;  %1324 = vmatpush3.bf16.msra.mxu0 %v1620_v27 }
  0x1b   :  { %1325 = vmatprep.subr.bf16.mxu0 %v1497_v0 }
  0x1d   :  { %1306 = vmatpush3.bf16.msra.mxu1 %v1647_v33 }
  0x1e   :  { %1307 = vmatprep.subr.bf16.mxu1 %v1497_v0  ;;  %1327 = vmatpush3.bf16.msra.mxu0 %v1633_v30 }
  0x1f   :  { %1328 = vmatprep.subr.bf16.mxu0 %v1497_v0 }
  0x21   :  { %1309 = vmatpush3.bf16.msra.mxu1 %v1659_v36 }
  0x22   :  { %1330 = vmatpush3.bf16.msra.mxu0 %v1647_v33  ;;  %1334 = vmatprep.subr.bf16.mxu1 %v1497_v0 }
  0x23   :  { %1331 = vmatprep.subr.bf16.mxu0 %v1497_v0 }
  0x24   :  { %1035 = vmatmul.mubr.f32.vlgmr.msra.gmra.mrb[0].mxu1 %v1499_v4 }
  0x25   :  { %1336 = vmatpush3.bf16.msra.mxu1 %v1548_v8  ;;  %1104 = vmatprep.mubr.msk.f32.mxu1 %vm1498_vm1, %v1499_v4 }
  0x26   :  { %1333 = vmatpush3.bf16.msra.mxu0 %v1659_v36  ;;  %1337 = vmatprep.subr.bf16.mxu1 %v1497_v0 }
  0x27   :  { %1358 = vmatprep.subr.bf16.mxu0 %v1497_v0 }
  0x29   :  { %1339 = vmatpush3.bf16.msra.mxu1 %v1561_v12 }
  0x2a   :  { %1340 = vmatprep.subr.bf16.mxu1 %v1497_v0 }
  0x2d   :  { %1342 = vmatpush3.bf16.msra.mxu1 %v1580_v17 }
  0x2e   :  { %1343 = vmatprep.subr.bf16.mxu1 %v1497_v0 }
  0x31   :  { %1345 = vmatpush3.bf16.msra.mxu1 %v1600_v22 }
  0x32   :  { %1346 = vmatprep.subr.bf16.mxu1 %v1497_v0 }
  0x35   :  { %1348 = vmatpush3.bf16.msra.mxu1 %v1620_v27 }
  0x36   :  { %1349 = vmatprep.subr.bf16.mxu1 %v1497_v0 }
  0x39   :  { %1351 = vmatpush3.bf16.msra.mxu1 %v1633_v30 }
  0x3a   :  { %1352 = vmatprep.subr.bf16.mxu1 %v1497_v0 }
  0x3d   :  { %1354 = vmatpush3.bf16.msra.mxu1 %v1647_v33 }
  0x3e   :  { %1355 = vmatprep.subr.bf16.mxu1 %v1497_v0 }
  0x41   :  { %1357 = vmatpush3.bf16.msra.mxu1 %v1659_v36 }
  0x42   :  { %1382 = vmatprep.subr.bf16.mxu1 %v1497_v0 }
  0xdb   :  { %v992_v38 = vpop.f32.mrb[0].mxu0 }
  0xdc   :  { %v133_v39 = vadd.f32 %v992_v38, %v824_v37  ;;  %v127_v40 = vpop.f32.mrb[1].mxu0 }
  0xdd   :  { %v128_v51 = vadd.f32 %v824_v37, %v127_v40 }
  0xdf   :  { %v995_v42 = vpop.f32.mrb[2].mxu0 }
  0xe0   :  { %v143_v43 = vadd.f32 %v995_v42, %v824_v37  ;;  %v137_v44 = vpop.f32.mrb[3].mxu0 }
  0xe1   :  { %v138_v45 = vadd.f32 %v824_v37, %v137_v44 }
  0xe3   :  { %v998_v47 = vpop.f32.mrb[4].mxu0 }
  0xe4   :  { %v153_v48 = vadd.f32 %v998_v47, %v824_v37  ;;  %v147_v49 = vpop.f32.mrb[5].mxu0 }
  0xe5   :  { %v148_v50 = vadd.f32 %v824_v37, %v147_v49 }
  0xe6   :  { %v353_v52 = vsel %vm176_vm2, %v138_v45, %v153_v48  ;;  %v1692_v53 = vsel %vm176_vm2, %v153_v48, %v138_v45 }
  0xe7   :  { %v1001_v54 = vpop.f32.mrb[6].mxu0  ;;  %v1694_v55 = vsel %vm176_vm2, %v143_v43, %v148_v50  ;;  %v1696_v56 = vsel %vm176_vm2, %v148_v50, %v143_v43 }
  0xe8   :  { %v163_v57 = vadd.f32 %v1001_v54, %v824_v37  ;;  %v157_v58 = vpop.f32.mrb[7].mxu0 }
  0xe9   :  { %v158_v59 = vadd.f32 %v824_v37, %v157_v58 }
  0xea   :  { %v196_v60 = vsel %vm176_vm2, %v128_v51, %v163_v57  ;;  %v1698_v61 = vsel %vm176_vm2, %v163_v57, %v128_v51 }
  0xeb   :  { %v274_v62 = vsel %vm176_vm2, %v133_v39, %v158_v59  ;;  %v1700_v63 = vsel %vm176_vm2, %v158_v59, %v133_v39 }
  0xf7   :  { %v263_v1 = vpop.f32.mrb[0].mxu1 }
  0xf8   :  { %v267_v2 = vadd.f32 %v263_v1, %v196_v60  ;;  %v1036_v3 = vpop.f32.mrb[1].mxu1 }
  0xfa   :  { %1481 = vtanh.f32 %v267_v2 }
 0x104   :  { %v1482_v5 = vpop.eup %1481 }
 0x105   :  { %269 = vst [vmem:[%s1826_s4] sm:$0xff] %v1482_v5  ;;  %1070 = vmatmul.mubr.f32.vlgmr.msra.gmra.mrb[8].mxu0 %v1482_v5 }
 0x106   :  { %1360 = vmatpush3.bf16.msra.mxu0 %v1548_v8  ;;  %1139 = vmatprep.mubr.msk.f32.mxu0 %vm1498_vm1, %v1499_v4 }
 0x107   :  { %1361 = vmatprep.subr.bf16.mxu0 %v1497_v0 }
 0x10a   :  { %1363 = vmatpush3.bf16.msra.mxu0 %v1561_v12 }
 0x10b   :  { %1364 = vmatprep.subr.bf16.mxu0 %v1497_v0 }
 0x10e   :  { %1366 = vmatpush3.bf16.msra.mxu0 %v1580_v17 }
 0x10f   :  { %1367 = vmatprep.subr.bf16.mxu0 %v1497_v0 }
 0x112   :  { %1369 = vmatpush3.bf16.msra.mxu0 %v1600_v22 }
 0x113   :  { %1370 = vmatprep.subr.bf16.mxu0 %v1497_v0 }
 0x116   :  { %1372 = vmatpush3.bf16.msra.mxu0 %v1620_v27 }
 0x117   :  { %1373 = vmatprep.subr.bf16.mxu0 %v1497_v0 }
 0x11a   :  { %1375 = vmatpush3.bf16.msra.mxu0 %v1633_v30 }
 0x11b   :  { %1376 = vmatprep.subr.bf16.mxu0 %v1497_v0 }
 0x11e   :  { %1378 = vmatpush3.bf16.msra.mxu0 %v1647_v33 }
 0x11f   :  { %1379 = vmatprep.subr.bf16.mxu0 %v1497_v0 }
 0x122   :  { %1381 = vmatpush3.bf16.msra.mxu0 %v1659_v36 }
 0x123   :  { %1406 = vmatprep.subr.bf16.mxu0 %v1497_v0 }
 0x1d8   :  { %v341_v6 = vpop.f32.mrb[8].mxu0 }
 0x1d9   :  { %v345_v7 = vadd.f32 %v341_v6, %v274_v62  ;;  %v1071_v9 = vpop.f32.mrb[9].mxu0 }
 0x1db   :  { %1483 = vtanh.f32 %v345_v7 }
 0x1e5   :  { %v1484_v10 = vpop.eup %1483 }
 0x1e6   :  { %833 = vst [vmem:[%s1826_s4 + $0x8] sm:$0xff] %v1484_v10  ;;  %1105 = vmatmul.mubr.f32.vlgmr.msra.gmra.mrb[2].mxu1 %v1484_v10 }
 0x1e7   :  { %1384 = vmatpush3.bf16.msra.mxu1 %v1548_v8  ;;  %1174 = vmatprep.mubr.msk.f32.mxu1 %vm1498_vm1, %v1499_v4 }
 0x1e8   :  { %1385 = vmatprep.subr.bf16.mxu1 %v1497_v0 }
 0x1eb   :  { %1387 = vmatpush3.bf16.msra.mxu1 %v1561_v12 }
 0x1ec   :  { %1388 = vmatprep.subr.bf16.mxu1 %v1497_v0 }
 0x1ef   :  { %1390 = vmatpush3.bf16.msra.mxu1 %v1580_v17 }
 0x1f0   :  { %1391 = vmatprep.subr.bf16.mxu1 %v1497_v0 }
 0x1f3   :  { %1393 = vmatpush3.bf16.msra.mxu1 %v1600_v22 }
 0x1f4   :  { %1394 = vmatprep.subr.bf16.mxu1 %v1497_v0 }
 0x1f7   :  { %1396 = vmatpush3.bf16.msra.mxu1 %v1620_v27 }
 0x1f8   :  { %1397 = vmatprep.subr.bf16.mxu1 %v1497_v0 }
 0x1fb   :  { %1399 = vmatpush3.bf16.msra.mxu1 %v1633_v30 }
 0x1fc   :  { %1400 = vmatprep.subr.bf16.mxu1 %v1497_v0 }
 0x1ff   :  { %1402 = vmatpush3.bf16.msra.mxu1 %v1647_v33 }
 0x200   :  { %1403 = vmatprep.subr.bf16.mxu1 %v1497_v0 }
 0x203   :  { %1405 = vmatpush3.bf16.msra.mxu1 %v1659_v36 }
 0x204   :  { %1430 = vmatprep.subr.bf16.mxu1 %v1497_v0 }
 0x2b9   :  { %v420_v11 = vpop.f32.mrb[2].mxu1 }
 0x2ba   :  { %v424_v13 = vadd.f32 %v420_v11, %v353_v52  ;;  %v1106_v14 = vpop.f32.mrb[3].mxu1 }
 0x2bc   :  { %1485 = vtanh.f32 %v424_v13 }
 0x2c6   :  { %v1486_v15 = vpop.eup %1485 }
 0x2c7   :  { %834 = vst [vmem:[%s1826_s4 + $0x10] sm:$0xff] %v1486_v15  ;;  %1140 = vmatmul.mubr.f32.vlgmr.msra.gmra.mrb[10].mxu0 %v1486_v15 }
 0x2c8   :  { %1408 = vmatpush3.bf16.msra.mxu0 %v1548_v8  ;;  %1209 = vmatprep.mubr.msk.f32.mxu0 %vm1498_vm1, %v1499_v4 }
 0x2c9   :  { %1409 = vmatprep.subr.bf16.mxu0 %v1497_v0 }
 0x2cc   :  { %1411 = vmatpush3.bf16.msra.mxu0 %v1561_v12 }
 0x2cd   :  { %1412 = vmatprep.subr.bf16.mxu0 %v1497_v0 }
 0x2d0   :  { %1414 = vmatpush3.bf16.msra.mxu0 %v1580_v17 }
 0x2d1   :  { %1415 = vmatprep.subr.bf16.mxu0 %v1497_v0 }
 0x2d4   :  { %1417 = vmatpush3.bf16.msra.mxu0 %v1600_v22 }
 0x2d5   :  { %1418 = vmatprep.subr.bf16.mxu0 %v1497_v0 }
 0x2d8   :  { %1420 = vmatpush3.bf16.msra.mxu0 %v1620_v27 }
 0x2d9   :  { %1421 = vmatprep.subr.bf16.mxu0 %v1497_v0 }
 0x2dc   :  { %1423 = vmatpush3.bf16.msra.mxu0 %v1633_v30 }
 0x2dd   :  { %1424 = vmatprep.subr.bf16.mxu0 %v1497_v0 }
 0x2e0   :  { %1426 = vmatpush3.bf16.msra.mxu0 %v1647_v33 }
 0x2e1   :  { %1427 = vmatprep.subr.bf16.mxu0 %v1497_v0 }
 0x2e4   :  { %1429 = vmatpush3.bf16.msra.mxu0 %v1659_v36 }
 0x2e5   :  { %1454 = vmatprep.subr.bf16.mxu0 %v1497_v0 }
 0x39a   :  { %v499_v16 = vpop.f32.mrb[10].mxu0 }
 0x39b   :  { %v503_v18 = vadd.f32 %v499_v16, %v1694_v55  ;;  %v1141_v19 = vpop.f32.mrb[11].mxu0 }
 0x39d   :  { %1487 = vtanh.f32 %v503_v18 }
 0x3a7   :  { %v1488_v20 = vpop.eup %1487 }
 0x3a8   :  { %835 = vst [vmem:[%s1826_s4 + $0x18] sm:$0xff] %v1488_v20  ;;  %1175 = vmatmul.mubr.f32.vlgmr.msra.gmra.mrb[4].mxu1 %v1488_v20 }
 0x3a9   :  { %1432 = vmatpush3.bf16.msra.mxu1 %v1548_v8  ;;  %1244 = vmatprep.mubr.msk.f32.mxu1 %vm1498_vm1, %v1499_v4 }
 0x3aa   :  { %1433 = vmatprep.subr.bf16.mxu1 %v1497_v0 }
 0x3ad   :  { %1435 = vmatpush3.bf16.msra.mxu1 %v1561_v12 }
 0x3ae   :  { %1436 = vmatprep.subr.bf16.mxu1 %v1497_v0 }
 0x3b1   :  { %1438 = vmatpush3.bf16.msra.mxu1 %v1580_v17 }
 0x3b2   :  { %1439 = vmatprep.subr.bf16.mxu1 %v1497_v0 }
 0x3b5   :  { %1441 = vmatpush3.bf16.msra.mxu1 %v1600_v22 }
 0x3b6   :  { %1442 = vmatprep.subr.bf16.mxu1 %v1497_v0 }
 0x3b9   :  { %1444 = vmatpush3.bf16.msra.mxu1 %v1620_v27 }
 0x3ba   :  { %1445 = vmatprep.subr.bf16.mxu1 %v1497_v0 }
 0x3bd   :  { %1447 = vmatpush3.bf16.msra.mxu1 %v1633_v30 }
 0x3be   :  { %1448 = vmatprep.subr.bf16.mxu1 %v1497_v0 }
 0x3c1   :  { %1450 = vmatpush3.bf16.msra.mxu1 %v1647_v33 }
 0x3c2   :  { %1451 = vmatprep.subr.bf16.mxu1 %v1497_v0 }
 0x3c5   :  { %1453 = vmatpush3.bf16.msra.mxu1 %v1659_v36 }
 0x47b   :  { %v576_v21 = vpop.f32.mrb[4].mxu1 }
 0x47c   :  { %v580_v23 = vadd.f32 %v576_v21, %v1696_v56  ;;  %v1176_v24 = vpop.f32.mrb[5].mxu1 }
 0x47e   :  { %1489 = vtanh.f32 %v580_v23 }
 0x488   :  { %v1490_v25 = vpop.eup %1489 }
 0x489   :  { %836 = vst [vmem:[%s1826_s4 + $0x20] sm:$0xff] %v1490_v25  ;;  %1210 = vmatmul.mubr.f32.vlgmr.msra.gmra.mrb[12].mxu0 %v1490_v25 }
 0x48a   :  { %1456 = vmatpush3.bf16.msra.mxu0 %v1548_v8  ;;  %1279 = vmatprep.mubr.msk.f32.mxu0 %vm1498_vm1, %v1499_v4 }
 0x48b   :  { %1457 = vmatprep.subr.bf16.mxu0 %v1497_v0 }
 0x48e   :  { %1459 = vmatpush3.bf16.msra.mxu0 %v1561_v12 }
 0x48f   :  { %1460 = vmatprep.subr.bf16.mxu0 %v1497_v0 }
 0x492   :  { %1462 = vmatpush3.bf16.msra.mxu0 %v1580_v17 }
 0x493   :  { %1463 = vmatprep.subr.bf16.mxu0 %v1497_v0 }
 0x496   :  { %1465 = vmatpush3.bf16.msra.mxu0 %v1600_v22 }
 0x497   :  { %1466 = vmatprep.subr.bf16.mxu0 %v1497_v0 }
 0x49a   :  { %1468 = vmatpush3.bf16.msra.mxu0 %v1620_v27 }
 0x49b   :  { %1469 = vmatprep.subr.bf16.mxu0 %v1497_v0 }
 0x49e   :  { %1471 = vmatpush3.bf16.msra.mxu0 %v1633_v30 }
 0x49f   :  { %1472 = vmatprep.subr.bf16.mxu0 %v1497_v0 }
 0x4a2   :  { %1474 = vmatpush3.bf16.msra.mxu0 %v1647_v33 }
 0x4a3   :  { %1475 = vmatprep.subr.bf16.mxu0 %v1497_v0 }
 0x4a6   :  { %1477 = vmatpush3.bf16.msra.mxu0 %v1659_v36 }
 0x55c   :  { %v653_v4 = vpop.f32.mrb[12].mxu0 }
 0x55d   :  { %v657_v8 = vadd.f32 %v653_v4, %v1692_v53  ;;  %v1211_v12 = vpop.f32.mrb[13].mxu0 }
 0x55f   :  { %1491 = vtanh.f32 %v657_v8 }
 0x569   :  { %v1492_v17 = vpop.eup %1491 }
 0x56a   :  { %837 = vst [vmem:[%s1826_s4 + $0x28] sm:$0xff] %v1492_v17  ;;  %1245 = vmatmul.mubr.f32.vlgmr.msra.gmra.mrb[6].mxu1 %v1492_v17 }
 0x63d   :  { %v730_v22 = vpop.f32.mrb[6].mxu1 }
 0x63e   :  { %v734_v26 = vadd.f32 %v730_v22, %v1700_v63  ;;  %v1246_v27 = vpop.f32.mrb[7].mxu1 }
 0x640   :  { %1493 = vtanh.f32 %v734_v26 }
 0x64a   :  { %v1494_v28 = vpop.eup %1493 }
 0x64b   :  { %838 = vst [vmem:[%s1826_s4 + $0x30] sm:$0xff] %v1494_v28  ;;  %1280 = vmatmul.mubr.f32.vlgmr.msra.gmra.mrb[14].mxu0 %v1494_v28 }
 0x71e   :  { %v807_v0 = vpop.f32.mrb[14].mxu0 }
 0x71f   :  { %v811_v29 = vadd.f32 %v807_v0, %v1698_v61  ;;  %v1281_v30 = vpop.f32.mrb[15].mxu0 }
 0x721   :  { %1495 = vtanh.f32 %v811_v29 }
 0x72b   :  { %v1496_v31 = vpop.eup %1495 }
 0x72c   :  { %839 = vst [vmem:[%s1826_s4 + $0x38] sm:$0xff] %v1496_v31  ;;  %815 = vst [vmem:[%s1827_s5] sm:$0xff] %v1496_v31 }

</bundles_post_ra>
